<compile_context>
chip_gen: v5e
topology: v5e:2x2
jax: 0.10.0
libtpu: 0.0.40
codegen_flags: <defaults>
</compile_context>

<pallas_src>
import jax
import jax.numpy as jnp
from jax.experimental import pallas as pl
from jax.experimental.pallas import tpu as pltpu

D = 200    # embedding dim hard-coded in the PyTorch module
DP = 256   # relation *output* dim zero-padded 200 -> 256 (2 x 128 lanes)


def _round_up(x, m):
    return ((x + m - 1) // m) * m


def _pick_rt(R, kp, itemsize, vmem_budget_bytes=8 * 1024 * 1024, min_steps=4):
    """Largest divisor of R whose double-buffered rel chunk fits the budget while
    (when possible) keeping >= min_steps grid steps (>= 2 per v7x TensorCore)."""
    per_rel = kp * DP * itemsize
    divisors = [d for d in range(1, R + 1) if R % d == 0]
    fits = [d for d in divisors if 2 * d * per_rel <= vmem_budget_bytes] or [1]
    target = min(min_steps, R)
    pref = [d for d in fits if R // d >= target]
    return max(pref) if pref else min(fits)


def prepare_rel(rel, rel_dtype=jnp.bfloat16):
    """One-time parameter preprocessing (hoisted out of the per-call forward).

    Returns rel_rhs of shape (NR, Kp, Rt*DP):
      * relation output dim zero-padded 200 -> 256 (clean per-rt 2x128-lane slices),
      * contraction dim kept at 200 (f32) / padded to 208 (bf16) -- NOT 256,
      * Rt relations fused along lanes,
      * stored in rel_dtype (bf16 default: halves the dominant HBM stream; the
        kernel keeps f32 MXU accumulation).
    """
    R = rel.shape[0]
    itemsize = jnp.dtype(rel_dtype).itemsize
    kp = _round_up(D, 8 if itemsize >= 4 else 16)        # 200 (f32) / 208 (bf16)
    rt = _pick_rt(R, kp, itemsize)
    nr = R // rt
    relp = jnp.pad(rel.astype(jnp.float32), ((0, 0), (0, kp - D), (0, DP - D)))
    rel_rhs = (relp.reshape(nr, rt, kp, DP)
                   .transpose(0, 2, 1, 3)
                   .reshape(nr, kp, rt * DP))
    return rel_rhs.astype(rel_dtype)


def _make_kernel(B, L1, L2, Rt, BL1p):
    BL1 = B * L1
    BL2 = B * L2

    def kernel(w1_ref, rel_ref, w2t_ref, bias_ref, out_ref, lhs2_ref):
        # w1_ref:   (B*L1, Kp)     word_1 stacked across batch            (resident)
        # rel_ref:  (Kp, Rt*DP)    Rt relation matrices fused along lanes (streamed)
        # w2t_ref:  (DP, B*L2)     word_2, pre-transposed in the wrapper  (resident)
        # bias_ref: (BL1p, B*L2)   additive 0/-inf pair-mask + same-batch (resident)
        # out_ref:  (Rt, B)        scores for this relation chunk (owned by this step)
        # lhs2_ref: (Rt*BL1p, DP)  VMEM scratch: stage-1 results, rt along sublanes
        neg_inf = jnp.float32(-jnp.inf)

        if BL1p != BL1:
            # Rows never written by stage 1: zero them so that, combined with the
            # -inf bias rows, they cannot poison the max.  Dead code when B*L1 % 8 == 0.
            lhs2_ref[...] = jnp.zeros((Rt * BL1p, DP), jnp.float32)

        w1 = w1_ref[...]

        # Stage 1: Rt well-shaped MXU matmuls (BL1, Kp) @ (Kp, DP), each written
        # straight into the VMEM scratch (relation index moves to sublanes).
        # Writing per-rt keeps register pressure low (no 32-vreg tmp_all live range).
        for rt in range(Rt):  # static unroll, Rt is small
            lhs2_ref[rt * BL1p:rt * BL1p + BL1, :] = jnp.dot(
                w1, rel_ref[:, rt * DP:(rt + 1) * DP],
                preferred_element_type=jnp.float32)

        # Stage 2: ONE batch-fused MXU matmul for the whole relation chunk
        # (replaces the Rt*B drain-bound (8,256)x(256,8) micro-matmuls).
        res = jnp.dot(lhs2_ref[...], w2t_ref[...],
                      preferred_element_type=jnp.float32)        # (Rt*BL1p, B*L2)

        # Additive bias = masked_fill(-inf) AND kills cross-batch columns.
        masked = res.reshape(Rt, BL1p, BL2) + bias_ref[...][None, :, :]
        m1 = jnp.max(masked, axis=1)                             # (Rt, B*L2)

        # Per-batch max over that batch's L2 lane segment -> (Rt, B), single store.
        lane = jax.lax.broadcasted_iota(jnp.int32, (Rt, B), 1)
        outv = jnp.full((Rt, B), neg_inf, dtype=jnp.float32)
        for b in range(B):  # static unroll, B is small
            col = jnp.max(m1[:, b * L2:(b + 1) * L2], axis=1, keepdims=True)
            outv = jnp.where(lane == b, col, outv)
        out_ref[...] = outv

    return kernel


@jax.jit
def w2v_forward(word_1, mask_1, word_2, mask_2, rel_rhs, linear_w):
    f32 = jnp.float32
    B, L1, d = word_1.shape
    L2 = word_2.shape[1]
    assert d == D
    NR, Kp, RtDP = rel_rhs.shape
    Rt = RtDP // DP
    R = NR * Rt
    BL1, BL2 = B * L1, B * L2
    BL1p = _round_up(BL1, 8)

    # word_1: stack batch along sublanes, zero-pad embedding to Kp, cast to the
    # rel streaming dtype (native bf16 MXU matmul with f32 accumulation).
    w1 = jnp.pad(word_1.astype(f32), ((0, 0), (0, 0), (0, Kp - d)))
    w1 = w1.reshape(BL1, Kp).astype(rel_rhs.dtype)

    # word_2: zero-pad embedding to DP and pre-transpose ONCE to (DP, B*L2) so the
    # kernel's stage-2 matmul needs no in-kernel transpose.
    w2p = jnp.pad(word_2.astype(f32), ((0, 0), (0, 0), (0, DP - d)))
    w2t = jnp.transpose(w2p, (2, 0, 1)).reshape(DP, BL2)

    # Additive 0 / -inf bias: (mask_1 x mask_2 == 0) positions AND cross-batch
    # columns of the batch-fused stage-2 result are sent to -inf.
    pair = mask_1.astype(f32)[:, :, None] * mask_2.astype(f32)[:, None, :]
    valid = (jnp.eye(B, dtype=bool)[:, None, :, None]
             & (pair != 0.0)[:, :, None, :])                      # (B, L1, B, L2)
    bias = jnp.where(valid, 0.0, -jnp.inf).astype(f32).reshape(BL1, BL2)
    if BL1p != BL1:
        bias = jnp.pad(bias, ((0, BL1p - BL1), (0, 0)), constant_values=-jnp.inf)

    kernel = _make_kernel(B, L1, L2, Rt, BL1p)

    flops = int(2 * R * BL1 * Kp * DP + 2 * R * BL1p * DP * BL2)
    bytes_accessed = int(rel_rhs.size * rel_rhs.dtype.itemsize
                         + 4 * (w1.size + w2t.size + bias.size + R * B))

    out = pl.pallas_call(
        kernel,
        out_shape=jax.ShapeDtypeStruct((NR, Rt, B), f32),
        grid_spec=pltpu.PrefetchScalarGridSpec(
            num_scalar_prefetch=0,
            grid=(NR,),
            in_specs=[
                pl.BlockSpec((BL1, Kp), lambda g: (0, 0)),               # resident
                pl.BlockSpec((None, Kp, Rt * DP), lambda g: (g, 0, 0)),  # rel chunk
                pl.BlockSpec((DP, BL2), lambda g: (0, 0)),               # resident
                pl.BlockSpec((BL1p, BL2), lambda g: (0, 0)),             # resident
            ],
            out_specs=pl.BlockSpec((None, Rt, B), lambda g: (g, 0, 0)),  # per-step block
            scratch_shapes=[pltpu.VMEM((Rt * BL1p, DP), jnp.float32)],
        ),
        compiler_params=pltpu.CompilerParams(
            dimension_semantics=("parallel",),      # each step owns its output block
            vmem_limit_bytes=32 * 1024 * 1024,      # actual use is a few MiB; v7x-safe
        ),
        cost_estimate=pl.CostEstimate(flops=flops, transcendentals=0,
                                      bytes_accessed=bytes_accessed),
    )(w1, rel_rhs, w2t, bias)

    scores = out.reshape(R, B).T                   # (B, R), column = relation index
    # nn.Linear(R, 3, bias=False): tiny glue matmul, kept in plain JAX.
    logits = scores @ linear_w.T
    return logits


def w2v_forward_ref(word_1, mask_1, word_2, mask_2, rel, linear_w):
    """Pure-JAX reference mirroring the PyTorch forward exactly."""
    R = rel.shape[0]
    B = word_1.shape[0]
    bil = jnp.einsum('bld,rde,bme->rblm', word_1, rel, word_2,
                     precision=jax.lax.Precision.HIGHEST)          # (R, B, L1, L2)
    mask = mask_1[:, :, None] * mask_2[:, None, :]                 # (B, L1, L2)
    bil = jnp.where(mask[None] == 0, -jnp.inf, bil)
    out = jnp.max(bil.reshape(R, B, -1), axis=2).T                 # (B, R)
    return out @ linear_w.T


if __name__ == "__main__":
    key = jax.random.PRNGKey(0)
    k1, k2, k3, k4, k5, k6 = jax.random.split(key, 6)

    B, L1, L2, R = 2, 8, 8, 16

    word_1 = jax.random.normal(k1, (B, L1, D), dtype=jnp.float32)
    word_2 = jax.random.normal(k2, (B, L2, D), dtype=jnp.float32)

    # 0/1 masks with at least the first position valid (avoids all -inf rows).
    mask_1 = (jax.random.uniform(k3, (B, L1)) > 0.3).astype(jnp.float32)
    mask_2 = (jax.random.uniform(k4, (B, L2)) > 0.3).astype(jnp.float32)
    mask_1 = mask_1.at[:, 0].set(1.0)
    mask_2 = mask_2.at[:, 0].set(1.0)

    # deterministic parameter init (shapes from __init__)
    xavier_std = (2.0 / (D + D)) ** 0.5                  # xavier_normal_ on (R, 200, 200)
    rel = xavier_std * jax.random.normal(k5, (R, D, D), dtype=jnp.float32)
    lin_bound = 1.0 / (R ** 0.5)                         # Linear(R, 3, bias=False)
    linear_w = jax.random.uniform(k6, (3, R), minval=-lin_bound, maxval=lin_bound,
                                  dtype=jnp.float32)

    ref = w2v_forward_ref(word_1, mask_1, word_2, mask_2, rel, linear_w)

    # --- exact f32 streaming path (bit-faithful module semantics) ---
    rel_rhs_f32 = jax.block_until_ready(prepare_rel(rel, rel_dtype=jnp.float32))
    logits_f32 = jax.block_until_ready(
        w2v_forward(word_1, mask_1, word_2, mask_2, rel_rhs_f32, linear_w))
    assert logits_f32.shape == (B, 3), logits_f32.shape
    assert jnp.allclose(logits_f32, ref, rtol=1e-4, atol=1e-3), (logits_f32, ref)

    # --- default perf path: rel streamed as bf16, f32 MXU accumulation ---
    rel_rhs_bf16 = jax.block_until_ready(prepare_rel(rel))
    logits_bf16 = jax.block_until_ready(
        w2v_forward(word_1, mask_1, word_2, mask_2, rel_rhs_bf16, linear_w))
    assert logits_bf16.shape == (B, 3), logits_bf16.shape
    # tight check against a reference using the identically bf16-rounded rel / word_1
    rel_q = rel.astype(jnp.bfloat16).astype(jnp.float32)
    w1_q = word_1.astype(jnp.bfloat16).astype(jnp.float32)
    ref_q = w2v_forward_ref(w1_q, mask_1, word_2, mask_2, rel_q, linear_w)
    assert jnp.allclose(logits_bf16, ref_q, rtol=1e-4, atol=1e-3), (logits_bf16, ref_q)
    # loose sanity check against the full-f32 reference (bf16 weight-stream error)
    assert jnp.allclose(logits_bf16, ref, rtol=2e-2, atol=2e-1), (logits_bf16, ref)

    print("KERNEL_OK")
</pallas_src>

<mosaic_0001>
module attributes {stable_mosaic.version = 11 : i64} {
  func.func @kernel(%arg0: i32, %arg1: memref<16x200xf32, #tpu.memory_space<vmem>>, %arg2: memref<1x200x1024xf32, #tpu.memory_space<vmem>>, %arg3: memref<256x16xf32, #tpu.memory_space<vmem>>, %arg4: memref<16x16xf32, #tpu.memory_space<vmem>>, %arg5: memref<1x4x2xf32, #tpu.memory_space<vmem>>, %arg6: memref<64x256xf32, #tpu.memory_space<vmem>>) attributes {dimension_semantics = [#tpu.dimension_semantics<parallel>], iteration_bounds = array<i64: 4>, scalar_prefetch = 0 : i64, scratch_operands = 1 : i64, tpu.core_type = #tpu.core_type<tc>, window_params = [{pipeline_mode = #tpu.pipeline_mode<synchronous>, transform_indices = @transform_0, window_bounds = array<i64: 16, 200>}, {transform_indices = @transform_1, window_bounds = array<i64: 1, 200, 1024>}, {pipeline_mode = #tpu.pipeline_mode<synchronous>, transform_indices = @transform_2, window_bounds = array<i64: 256, 16>}, {pipeline_mode = #tpu.pipeline_mode<synchronous>, transform_indices = @transform_3, window_bounds = array<i64: 16, 16>}, {transform_indices = @transform_4, window_bounds = array<i64: 1, 4, 2>}]} {
    %c0 = arith.constant 0 : index
    %c0_0 = arith.constant 0 : index
    %0 = vector.load %arg1[%c0, %c0_0] : memref<16x200xf32, #tpu.memory_space<vmem>>, vector<16x200xf32>
    %c0_1 = arith.constant 0 : index
    %c0_2 = arith.constant 0 : index
    %c0_3 = arith.constant 0 : index
    %1 = vector.load %arg2[%c0_1, %c0_2, %c0_3] : memref<1x200x1024xf32, #tpu.memory_space<vmem>>, vector<1x200x256xf32>
    %2 = vector.shape_cast %1 : vector<1x200x256xf32> to vector<200x256xf32>
    %cst = arith.constant dense<0.000000e+00> : vector<16x256xf32>
    %3 = tpu.matmul %0, %2, %cst {dimension_numbers = #tpu.dot_dimension_numbers<[1], [0], [0], [1], [0, 0, 1, 1], [], []>} : vector<16x200xf32>, vector<200x256xf32>, vector<16x256xf32> -> vector<16x256xf32>
    %c0_4 = arith.constant 0 : index
    %c0_5 = arith.constant 0 : index
    %4 = vector.load %arg6[%c0_4, %c0_5] : memref<64x256xf32, #tpu.memory_space<vmem>>, vector<16x256xf32>
    tpu.vector_store %arg6[%c0_4, %c0_5], %3 {strides = array<i32>} : memref<64x256xf32, #tpu.memory_space<vmem>>, vector<16x256xf32>,
    %c0_6 = arith.constant 0 : index
    %c0_7 = arith.constant 0 : index
    %c256 = arith.constant 256 : index
    %5 = vector.load %arg2[%c0_6, %c0_7, %c256] : memref<1x200x1024xf32, #tpu.memory_space<vmem>>, vector<1x200x256xf32>
    %6 = vector.shape_cast %5 : vector<1x200x256xf32> to vector<200x256xf32>
    %cst_8 = arith.constant dense<0.000000e+00> : vector<16x256xf32>
    %7 = tpu.matmul %0, %6, %cst_8 {dimension_numbers = #tpu.dot_dimension_numbers<[1], [0], [0], [1], [0, 0, 1, 1], [], []>} : vector<16x200xf32>, vector<200x256xf32>, vector<16x256xf32> -> vector<16x256xf32>
    %c16 = arith.constant 16 : index
    %c0_9 = arith.constant 0 : index
    %8 = vector.load %arg6[%c16, %c0_9] : memref<64x256xf32, #tpu.memory_space<vmem>>, vector<16x256xf32>
    tpu.vector_store %arg6[%c16, %c0_9], %7 {strides = array<i32>} : memref<64x256xf32, #tpu.memory_space<vmem>>, vector<16x256xf32>,
    %c0_10 = arith.constant 0 : index
    %c0_11 = arith.constant 0 : index
    %c512 = arith.constant 512 : index
    %9 = vector.load %arg2[%c0_10, %c0_11, %c512] : memref<1x200x1024xf32, #tpu.memory_space<vmem>>, vector<1x200x256xf32>
    %10 = vector.shape_cast %9 : vector<1x200x256xf32> to vector<200x256xf32>
    %cst_12 = arith.constant dense<0.000000e+00> : vector<16x256xf32>
    %11 = tpu.matmul %0, %10, %cst_12 {dimension_numbers = #tpu.dot_dimension_numbers<[1], [0], [0], [1], [0, 0, 1, 1], [], []>} : vector<16x200xf32>, vector<200x256xf32>, vector<16x256xf32> -> vector<16x256xf32>
    %c32 = arith.constant 32 : index
    %c0_13 = arith.constant 0 : index
    %12 = vector.load %arg6[%c32, %c0_13] : memref<64x256xf32, #tpu.memory_space<vmem>>, vector<16x256xf32>
    tpu.vector_store %arg6[%c32, %c0_13], %11 {strides = array<i32>} : memref<64x256xf32, #tpu.memory_space<vmem>>, vector<16x256xf32>,
    %c0_14 = arith.constant 0 : index
    %c0_15 = arith.constant 0 : index
    %c768 = arith.constant 768 : index
    %13 = vector.load %arg2[%c0_14, %c0_15, %c768] : memref<1x200x1024xf32, #tpu.memory_space<vmem>>, vector<1x200x256xf32>
    %14 = vector.shape_cast %13 : vector<1x200x256xf32> to vector<200x256xf32>
    %cst_16 = arith.constant dense<0.000000e+00> : vector<16x256xf32>
    %15 = tpu.matmul %0, %14, %cst_16 {dimension_numbers = #tpu.dot_dimension_numbers<[1], [0], [0], [1], [0, 0, 1, 1], [], []>} : vector<16x200xf32>, vector<200x256xf32>, vector<16x256xf32> -> vector<16x256xf32>
    %c48 = arith.constant 48 : index
    %c0_17 = arith.constant 0 : index
    %16 = vector.load %arg6[%c48, %c0_17] : memref<64x256xf32, #tpu.memory_space<vmem>>, vector<16x256xf32>
    tpu.vector_store %arg6[%c48, %c0_17], %15 {strides = array<i32>} : memref<64x256xf32, #tpu.memory_space<vmem>>, vector<16x256xf32>,
    %c0_18 = arith.constant 0 : index
    %c0_19 = arith.constant 0 : index
    %17 = vector.load %arg6[%c0_18, %c0_19] : memref<64x256xf32, #tpu.memory_space<vmem>>, vector<64x256xf32>
    %c0_20 = arith.constant 0 : index
    %c0_21 = arith.constant 0 : index
    %18 = vector.load %arg3[%c0_20, %c0_21] : memref<256x16xf32, #tpu.memory_space<vmem>>, vector<256x16xf32>
    %cst_22 = arith.constant dense<0.000000e+00> : vector<64x16xf32>
    %19 = tpu.matmul %17, %18, %cst_22 {dimension_numbers = #tpu.dot_dimension_numbers<[1], [0], [0], [1], [0, 0, 1, 1], [], []>} : vector<64x256xf32>, vector<256x16xf32>, vector<64x16xf32> -> vector<64x16xf32>
    %20 = vector.shape_cast %19 : vector<64x16xf32> to vector<4x16x16xf32>
    %c0_23 = arith.constant 0 : index
    %c0_24 = arith.constant 0 : index
    %21 = vector.load %arg4[%c0_23, %c0_24] : memref<16x16xf32, #tpu.memory_space<vmem>>, vector<16x16xf32>
    %22 = vector.shape_cast %21 : vector<16x16xf32> to vector<1x16x16xf32>
    %23 = vector.broadcast %22 : vector<1x16x16xf32> to vector<4x16x16xf32>
    %24 = arith.addf %20, %23 : vector<4x16x16xf32>
    %cst_25 = arith.constant dense<0xFF800000> : vector<4x16xf32>
    %25 = vector.multi_reduction <maximumf>, %24, %cst_25 [1] : vector<4x16x16xf32> to vector<4x16xf32>
    %26 = tpu.iota {dimensions = array<i32: 1>} : vector<4x2xi32>
    %cst_26 = arith.constant 0xFF800000 : f32
    %27 = vector.broadcast %cst_26 : f32 to vector<4x2xf32>
    %28 = vector.extract_strided_slice %25 {offsets = [0, 0], sizes = [4, 8], strides = [1, 1]} : vector<4x16xf32> to vector<4x8xf32>
    %cst_27 = arith.constant dense<0xFF800000> : vector<4xf32>
    %29 = vector.multi_reduction <maximumf>, %28, %cst_27 [1] : vector<4x8xf32> to vector<4xf32>
    %30 = vector.shape_cast %29 : vector<4xf32> to vector<4x1xf32>
    %c0_i32 = arith.constant 0 : i32
    %31 = vector.broadcast %c0_i32 : i32 to vector<4x2xi32>
    %32 = arith.cmpi eq, %26, %31 : vector<4x2xi32>
    %33 = vector.shape_cast %30 : vector<4x1xf32> to vector<4x1xf32>
    %34 = vector.broadcast %33 : vector<4x1xf32> to vector<4x2xf32>
    %35 = arith.select %32, %34, %27 : vector<4x2xi1>, vector<4x2xf32>
    %36 = vector.extract_strided_slice %25 {offsets = [0, 8], sizes = [4, 8], strides = [1, 1]} : vector<4x16xf32> to vector<4x8xf32>
    %cst_28 = arith.constant dense<0xFF800000> : vector<4xf32>
    %37 = vector.multi_reduction <maximumf>, %36, %cst_28 [1] : vector<4x8xf32> to vector<4xf32>
    %38 = vector.shape_cast %37 : vector<4xf32> to vector<4x1xf32>
    %c1_i32 = arith.constant 1 : i32
    %39 = vector.broadcast %c1_i32 : i32 to vector<4x2xi32>
    %40 = arith.cmpi eq, %26, %39 : vector<4x2xi32>
    %41 = vector.shape_cast %38 : vector<4x1xf32> to vector<4x1xf32>
    %42 = vector.broadcast %41 : vector<4x1xf32> to vector<4x2xf32>
    %43 = arith.select %40, %42, %35 : vector<4x2xi1>, vector<4x2xf32>
    %c0_29 = arith.constant 0 : index
    %c0_30 = arith.constant 0 : index
    %c0_31 = arith.constant 0 : index
    %44 = vector.load %arg5[%c0_29, %c0_30, %c0_31] : memref<1x4x2xf32, #tpu.memory_space<vmem>>, vector<1x4x2xf32>
    %45 = vector.shape_cast %44 : vector<1x4x2xf32> to vector<4x2xf32>
    %46 = vector.shape_cast %43 : vector<4x2xf32> to vector<1x4x2xf32>
    tpu.vector_store %arg5[%c0_29, %c0_30, %c0_31], %46 {strides = array<i32>} : memref<1x4x2xf32, #tpu.memory_space<vmem>>, vector<1x4x2xf32>,
    return
  }
  func.func @transform_0(%arg0: i32) -> (i32, i32) {
    %c0_i32 = arith.constant 0 : i32
    %c0_i32_0 = arith.constant 0 : i32
    %c0_i32_1 = arith.constant 0 : i32
    return %c0_i32, %c0_i32_0 : i32, i32
  }
  func.func @transform_1(%arg0: i32) -> (i32, i32, i32) {
    %c0_i32 = arith.constant 0 : i32
    %c0_i32_0 = arith.constant 0 : i32
    %c0_i32_1 = arith.constant 0 : i32
    return %arg0, %c0_i32, %c0_i32_0 : i32, i32, i32
  }
  func.func @transform_2(%arg0: i32) -> (i32, i32) {
    %c0_i32 = arith.constant 0 : i32
    %c0_i32_0 = arith.constant 0 : i32
    %c0_i32_1 = arith.constant 0 : i32
    return %c0_i32, %c0_i32_0 : i32, i32
  }
  func.func @transform_3(%arg0: i32) -> (i32, i32) {
    %c0_i32 = arith.constant 0 : i32
    %c0_i32_0 = arith.constant 0 : i32
    %c0_i32_1 = arith.constant 0 : i32
    return %c0_i32, %c0_i32_0 : i32, i32
  }
  func.func @transform_4(%arg0: i32) -> (i32, i32, i32) {
    %c0_i32 = arith.constant 0 : i32
    %c0_i32_0 = arith.constant 0 : i32
    %c0_i32_1 = arith.constant 0 : i32
    return %arg0, %c0_i32, %c0_i32_0 : i32, i32, i32
  }
}

</mosaic_0001>

<bundles_post_ra>
// kernel: w2v_forward.1
= control target key start
LH: loop header
LB: loop body
LE: loop exit
PB: predicated region body
PF: predicated region fallthrough
CT: control target
= control target key end

     0   :  { %9 = vsyncpa [#allocation4], 0  ;;  %s1795_s0 = inlined_call_operand.hbm [shape: f32[16,200], index: 0, kind: input, shape index: {}]   ;;  %s1796_s1 = inlined_call_operand.hbm [shape: f32[4,200,1024], index: 1, kind: input, shape index: {}]   ;;  %s1797_s2 = inlined_call_operand.vmem [shape: f32[256,16], index: 2, kind: input, shape index: {}]   ;;  %s1798_s3 = inlined_call_operand.vmem [shape: f32[16,16], index: 3, kind: input, shape index: {}]   ;;  %s1799_s4 = inlined_call_operand.vmem [shape: f32[4,4,2], index: 4, kind: output, shape index: {}]  }
   0x1   :  { %10 = vsyncpa [#allocation6], 0 }
   0x2   :  { %12 = vsyncpa [#allocation6 + $0x1], 0  ;;  %s1324_s15 = smov 0   ;;  %s1326_s16 = smov 0  }
   0x3   :  { %s1328_s17 = smov 0   ;;  %s1330_s18 = smov 0  }
   0x4 LB: > { %s1343_s19 = sadd.s32 4294967295, %s1292_s18   ;;  %p59_p0 = scmp.ne.s32.totalorder %s1284_s16, %s1280_s15  ;;  %s1292_s18 = sphi %s1330_s18, %s1806_s18   ;;  %s1288_s17 = sphi %s1328_s17, %s1805_s17   ;;  %s1284_s16 = sphi %s1326_s16, %s1804_s16   ;;  %s1280_s15 = sphi %s1324_s15, %s1803_s15  }
   0x5   : > { %p60_p1 = scmp.eq.s32.totalorder %s1343_s19, 0  ;;  %p1112_p2 = scmp.ge.s32.totalorder %s1292_s18, 1 }
   0x6   : > { %p138_p3 = scmp.lt.s32.totalorder %s1292_s18, 5  ;;  %s149_s23 = sshll.u32 %s1795_s0, 4  ;;  %s150_s23 = int_to_ptr.hbm [resolvable:$true] %s149_s23 }
   0x7   : > { %p1351_p4 = por %p60_p1, %p59_p0  ;;  %s1294_s25 = smov [#allocation3]  }
   0x8   : > { %p1358_p5 = pnand %p1112_p2, %p138_p3  ;;  %s151_s26 = sshll.u32 %s1294_s25, 4  ;;  %s152_s26 = int_to_ptr.vmem [resolvable:$true] %s151_s26 }
   0x9   : > { %s1367_s27 = sadd.s32 1, %s1292_s18   ;;  %s1295_s28 = smov 256  }
   0xa   : > { %p1146_p6 = pneg %p1358_p5  ;;  %s1296_s29 = smov 16  }
   0xb   : > { %s43_s30 = ssub.s32 %s1292_s18, %s1367_s27  ;;  %s46_s5 = sadd.s32 1, %s1288_s17 }
   0xc   : > { %p1147_p7 = pnand %p1146_p6, %p60_p1  ;;  %p44_p8 = scmp.eq.s32.totalorder %s43_s30, 0 }
   0xd   : > { %p53_p9 = scmp.ne.s32.totalorder %s1288_s17, %s1284_s16  ;;  %p54_p10 = scmp.eq.s32.totalorder %s1292_s18, 0 }
   0xe   : > { %1149 = dma.hbm_to_vmem [thread:$0]  (!%p1147_p7), %s150_s23, 512, %s152_s26, [#allocation4], %s1295_s28, %s1295_s28, %s1296_s29  }
   0xf   : > { %p1155_p11 = scmp.lt.s32.totalorder %s1292_s18, 4  ;;  %p55_p12 = por %p54_p10, %p53_p9 }
  0x10   : > { %s1377_s6 = scalar_select %p44_p8, %s1288_s17, %s46_s5  }
  0x11   : > { %s171_s7 = sand.u32 1, %s1288_s17   ;;  %s1138_s9 = smul.u32 1600, %s1292_s18 }
  0x12   : > { %s1137_s8 = smul.u32 1600, %s171_s7  ;;  %p1381_p13 = pnand %p1155_p11, %p55_p12 }
  0x13   : > { %s180_s13 = scalar_lea.hbm %s1796_s1, %s1138_s9  ;;  %s172_s22 = scalar_lea.sflag [#allocation6], %s171_s7 }
  0x14   : > { %s175_s14 = scalar_lea.vmem [#allocation5], %s1137_s8  ;;  %s181_s21 = sshll.u32 %s180_s13, 4  ;;  %s182_s21 = int_to_ptr.hbm [resolvable:$true] %s181_s21 }
  0x15   : > { %s183_s15 = sshll.u32 %s175_s14, 4  ;;  %s1224_s23 = sshra.s32 %s182_s21, 4  ;;  %s184_s15 = int_to_ptr.vmem [resolvable:$true] %s183_s15  ;;  %s1225_s23 = int_to_ptr.hbm [resolvable:$true] %s1224_s23 }
  0x16   : > { %s1226_s25 = scalar_lea.hbm %s1225_s23, 1600  ;;  %p1228_p2 = pneg %p1381_p13 }
  0x17   : > { %p1227_p0 = scmp.ne.s32.totalorder %s1225_s23, %s1226_s25  ;;  %s1231_s28 = scalar_lea.hbm %s1796_s1, 6400 }
  0x18   : > { %p1232_p7 = scmp.lt.s32.totalorder %s1225_s23, %s1796_s1  ;;  %p1233_p8 = scmp.lt.s32.totalorder %s1231_s28, %s1226_s25 }
  0x19   : > { %p1229_p3 = pnand %p1228_p2, %p1227_p0 }
  0x1a   : > { %p1234_p9 = por %p1233_p8, %p1232_p7 }
  0x1b   : > { %p1230_p6 = pneg %p1229_p3 }
  0x1d   : > { %p1235_p10 = pnand %p1234_p9, %p1230_p6 }
  0x1f   : > { %1238 = shalt.err (!%p1235_p10)
}
  0x20   : > { %s1297_s5 = smov 1024   ;;  %s1298_s7 = smov 64  }
  0x21   : > { %1153 = dma.hbm_to_vmem [thread:$0]  (!%p1381_p13), %s182_s21, 25600, %s184_s15, %s172_s22, %s1297_s5, %s1297_s5, %s1298_s7  }
  0x22   : > { %195 = sbr.rel (%p1358_p5) target bundleno = 600 (0x258), region = 36 }
  0x27   : > { %1271 = dma.done.wait (%p60_p1), [#allocation4], 512  }
  0x28   : > { %1273 = vsyncadd (%p60_p1), [#allocation4], 4294966784  ;;  %s202_s8 = sand.u32 1, %s1284_s16  }
  0x29   : > { %s1139_s9 = smul.u32 1600, %s202_s8  ;;  %s203_s11 = scalar_lea.sflag [#allocation6], %s202_s8 }
  0x2b   : > { %s1405_s12 = scalar_lea.vmem [#allocation5], %s1139_s9 }
  0x2c   : > { %1275 = dma.done.wait (%p1351_p4), %s203_s11, 25600  }
  0x2d   : > { %1277 = vsyncadd (%p1351_p4), %s203_s11, 4294941696  ;;  %v269_v0 = vld [vmem:[%s1405_s12 + $0x3c0] sm:$0xff]  ;;  %v270_v1 = vld [vmem:[%s1405_s12 + $0x3c8] sm:$0xff]  ;;  %vm289_vm0 = vcmask 588800   ;;  %vm970_vm1 = vcmask 130048   ;;  %vm1013_vm2 = vcmask 1041409  }
  0x2e   : > { %v267_v2 = vld [vmem:[%s1405_s12 + $0x380] sm:$0xff]  ;;  %296 = vmatpush.msra.mxu0 %v269_v0  ;;  %342 = vmatpush.msra.mxu2 %v270_v1  ;;  %v268_v3 = vld [vmem:[%s1405_s12 + $0x388] sm:$0xff]  ;;  %v422_v51 = vld [vmem:[%s1405_s12 + $0x3d0] sm:$0xff]  ;;  %vm1015_vm3 = vcmask 1042434   ;;  %vm1017_vm4 = vcmask 1043459   ;;  %vm1020_vm5 = vcmask 60416  }
  0x2f   : > { %v265_v4 = vld [vmem:[%s1405_s12 + $0x340] sm:$0xff]  ;;  %v266_v5 = vld [vmem:[%s1405_s12 + $0x348] sm:$0xff]  ;;  %v423_v52 = vld [vmem:[%s1405_s12 + $0x3d8] sm:$0xff]  ;;  %vm1026_vm6 = vcmask 126016   ;;  %p231_p1 = scmp.lt.s32.totalorder %s1343_s19, 3  ;;  %vm1032_vm9 = vcmask 11264  }
  0x30   : > { %297 = vmatpush.msra.mxu0 %v267_v2  ;;  %343 = vmatpush.msra.mxu2 %v268_v3  ;;  %v263_v6 = vld [vmem:[%s1405_s12 + $0x300] sm:$0xff]  ;;  %v264_v7 = vld [vmem:[%s1405_s12 + $0x308] sm:$0xff]  ;;  %v420_v54 = vld [vmem:[%s1405_s12 + $0x390] sm:$0xff] }
  0x31   : > { %v261_v8 = vld [vmem:[%s1405_s12 + $0x2c0] sm:$0xff]  ;;  %v262_v9 = vld [vmem:[%s1405_s12 + $0x2c8] sm:$0xff]  ;;  %v421_v55 = vld [vmem:[%s1405_s12 + $0x398] sm:$0xff]  ;;  %s1808_s19 = smov (!%p231_p1, %s1343_s19), 3 }
  0x32   : > { %298 = vmatpush.msra.mxu0 %v265_v4  ;;  %344 = vmatpush.msra.mxu2 %v266_v5  ;;  %v259_v10 = vld [vmem:[%s1405_s12 + $0x280] sm:$0xff]  ;;  %v260_v11 = vld [vmem:[%s1405_s12 + $0x288] sm:$0xff]  ;;  %v440_v56 = vld [vmem:[%s1405_s12 + $0x610] sm:$0xff]  ;;  %s1118_s21 = sshll.u32 %s1808_s19, 2 }
  0x33   : > { %v257_v12 = vld [vmem:[%s1405_s12 + $0x240] sm:$0xff]  ;;  %v258_v13 = vld [vmem:[%s1405_s12 + $0x248] sm:$0xff]  ;;  %v418_v57 = vld [vmem:[%s1405_s12 + $0x350] sm:$0xff]  ;;  %s234_s25 = scalar_lea.vmem %s1799_s4, %s1118_s21 }
  0x34   : > { %299 = vmatpush.msra.mxu0 %v263_v6  ;;  %345 = vmatpush.msra.mxu2 %v264_v7  ;;  %v287_v14 = vld [vmem:[%s1405_s12 + $0x600] sm:$0xff]  ;;  %v288_v16 = vld [vmem:[%s1405_s12 + $0x608] sm:$0xff]  ;;  %v419_v58 = vld [vmem:[%s1405_s12 + $0x358] sm:$0xff] }
  0x35   : > { %v255_v15 = vld [vmem:[%s1405_s12 + $0x200] sm:$0xff]  ;;  %v256_v17 = vld [vmem:[%s1405_s12 + $0x208] sm:$0xff]  ;;  %326 = vmatpush.msra.mxu1 %v287_v14  ;;  %372 = vmatpush.msra.mxu3 %v288_v16  ;;  %v438_v59 = vld [vmem:[%s1405_s12 + $0x5d0] sm:$0xff] }
  0x36   : > { %300 = vmatpush.msra.mxu0 %v261_v8  ;;  %346 = vmatpush.msra.mxu2 %v262_v9  ;;  %v285_v18 = vld [vmem:[%s1405_s12 + $0x5c0] sm:$0xff]  ;;  %v286_v19 = vld [vmem:[%s1405_s12 + $0x5c8] sm:$0xff]  ;;  %v416_v60 = vld [vmem:[%s1405_s12 + $0x310] sm:$0xff] }
  0x37   : > { %v283_v20 = vld [vmem:[%s1405_s12 + $0x580] sm:$0xff]  ;;  %v284_v21 = vld [vmem:[%s1405_s12 + $0x588] sm:$0xff]  ;;  %327 = vmatpush.msra.mxu1 %v285_v18  ;;  %373 = vmatpush.msra.mxu3 %v286_v19  ;;  %v417_v61 = vld [vmem:[%s1405_s12 + $0x318] sm:$0xff] }
  0x38   : > { %301 = vmatpush.msra.mxu0 %v259_v10  ;;  %347 = vmatpush.msra.mxu2 %v260_v11  ;;  %v253_v22 = vld [vmem:[%s1405_s12 + $0x1c0] sm:$0xff]  ;;  %v254_v23 = vld [vmem:[%s1405_s12 + $0x1c8] sm:$0xff]  ;;  %v1481_v62 = vld [vmem:[#allocation3 + $0x18] sm:$0xff] }
  0x39   : > { %v281_v24 = vld [vmem:[%s1405_s12 + $0x540] sm:$0xff]  ;;  %v282_v25 = vld [vmem:[%s1405_s12 + $0x548] sm:$0xff]  ;;  %328 = vmatpush.msra.mxu1 %v283_v20  ;;  %374 = vmatpush.msra.mxu3 %v284_v21  ;;  %v414_v63 = vld [vmem:[%s1405_s12 + $0x2d0] sm:$0xff] }
  0x3a   : > { %302 = vmatpush.msra.mxu0 %v257_v12  ;;  %348 = vmatpush.msra.mxu2 %v258_v13  ;;  %v251_v26 = vld [vmem:[%s1405_s12 + $0x180] sm:$0xff]  ;;  %v252_v27 = vld [vmem:[%s1405_s12 + $0x188] sm:$0xff]  ;;  %v415_v0 = vld [vmem:[%s1405_s12 + $0x2d8] sm:$0xff] }
  0x3b   : > { %v279_v28 = vld [vmem:[%s1405_s12 + $0x500] sm:$0xff]  ;;  %v280_v29 = vld [vmem:[%s1405_s12 + $0x508] sm:$0xff]  ;;  %329 = vmatpush.msra.mxu1 %v281_v24  ;;  %375 = vmatpush.msra.mxu3 %v282_v25  ;;  %v1485_v1 = vld [vmem:[#allocation3 + $0x10] sm:$0xff] }
  0x3c   : > { %303 = vmatpush.msra.mxu0 %v255_v15  ;;  %349 = vmatpush.msra.mxu2 %v256_v17  ;;  %v249_v30 = vld [vmem:[%s1405_s12 + $0x140] sm:$0xff]  ;;  %v250_v31 = vld [vmem:[%s1405_s12 + $0x148] sm:$0xff]  ;;  %v412_v2 = vld [vmem:[%s1405_s12 + $0x290] sm:$0xff] }
  0x3d   : > { %v277_v32 = vld [vmem:[%s1405_s12 + $0x4c0] sm:$0xff]  ;;  %v278_v33 = vld [vmem:[%s1405_s12 + $0x4c8] sm:$0xff]  ;;  %330 = vmatpush.msra.mxu1 %v279_v28  ;;  %376 = vmatpush.msra.mxu3 %v280_v29  ;;  %v413_v3 = vld [vmem:[%s1405_s12 + $0x298] sm:$0xff] }
  0x3e   : > { %304 = vmatpush.msra.mxu0 %v253_v22  ;;  %350 = vmatpush.msra.mxu2 %v254_v23  ;;  %v247_v34 = vld [vmem:[%s1405_s12 + $0x100] sm:$0xff]  ;;  %v248_v35 = vld [vmem:[%s1405_s12 + $0x108] sm:$0xff]  ;;  %v436_v4 = vld [vmem:[%s1405_s12 + $0x590] sm:$0xff] }
  0x3f   : > { %v275_v36 = vld [vmem:[%s1405_s12 + $0x480] sm:$0xff]  ;;  %v276_v37 = vld [vmem:[%s1405_s12 + $0x488] sm:$0xff]  ;;  %331 = vmatpush.msra.mxu1 %v277_v32  ;;  %377 = vmatpush.msra.mxu3 %v278_v33  ;;  %v410_v5 = vld [vmem:[%s1405_s12 + $0x250] sm:$0xff] }
  0x40   : > { %305 = vmatpush.msra.mxu0 %v251_v26  ;;  %351 = vmatpush.msra.mxu2 %v252_v27  ;;  %v245_v38 = vld [vmem:[%s1405_s12 + $0xc0] sm:$0xff]  ;;  %v246_v39 = vld [vmem:[%s1405_s12 + $0xc8] sm:$0xff]  ;;  %v411_v6 = vld [vmem:[%s1405_s12 + $0x258] sm:$0xff] }
  0x41   : > { %v273_v40 = vld [vmem:[%s1405_s12 + $0x440] sm:$0xff]  ;;  %v274_v41 = vld [vmem:[%s1405_s12 + $0x448] sm:$0xff]  ;;  %332 = vmatpush.msra.mxu1 %v275_v36  ;;  %378 = vmatpush.msra.mxu3 %v276_v37  ;;  %v434_v7 = vld [vmem:[%s1405_s12 + $0x550] sm:$0xff] }
  0x42   : > { %306 = vmatpush.msra.mxu0 %v249_v30  ;;  %352 = vmatpush.msra.mxu2 %v250_v31  ;;  %v243_v42 = vld [vmem:[%s1405_s12 + $0x80] sm:$0xff]  ;;  %v244_v43 = vld [vmem:[%s1405_s12 + $0x88] sm:$0xff]  ;;  %v408_v8 = vld [vmem:[%s1405_s12 + $0x210] sm:$0xff] }
  0x43   : > { %v271_v44 = vld [vmem:[%s1405_s12 + $0x400] sm:$0xff]  ;;  %v272_v45 = vld [vmem:[%s1405_s12 + $0x408] sm:$0xff]  ;;  %333 = vmatpush.msra.mxu1 %v273_v40  ;;  %379 = vmatpush.msra.mxu3 %v274_v41  ;;  %v409_v9 = vld [vmem:[%s1405_s12 + $0x218] sm:$0xff] }
  0x44   : > { %307 = vmatpush.msra.mxu0 %v247_v34  ;;  %353 = vmatpush.msra.mxu2 %v248_v35  ;;  %v241_v46 = vld [vmem:[%s1405_s12 + $0x40] sm:$0xff]  ;;  %v242_v47 = vld [vmem:[%s1405_s12 + $0x48] sm:$0xff]  ;;  %v432_v10 = vld [vmem:[%s1405_s12 + $0x510] sm:$0xff] }
  0x45   : > { %v1459_v48 = vld [vmem:[#allocation3 + $0x8] sm:$0xff]  ;;  %v239_v49 = vld [vmem:[%s1405_s12] sm:$0xff]  ;;  %334 = vmatpush.msra.mxu1 %v271_v44  ;;  %380 = vmatpush.msra.mxu3 %v272_v45  ;;  %v406_v11 = vld [vmem:[%s1405_s12 + $0x1d0] sm:$0xff] }
  0x46   : > { %308 = vmatpush.msra.mxu0 %v245_v38  ;;  %354 = vmatpush.msra.mxu2 %v246_v39  ;;  %v240_v50 = vld [vmem:[%s1405_s12 + $0x8] sm:$0xff]  ;;  %v1465_v53 = vld [vmem:[#allocation3] sm:$0xff]  ;;  %v407_v12 = vld [vmem:[%s1405_s12 + $0x1d8] sm:$0xff] }
  0x47   : > { %1119 = vmatmul.msk.f32.vlgmr.msra.gmra.mxu1 %vm289_vm0, %v1459_v48  ;;  %1121 = vmatmul.msk.f32.vlgmr.msra.gmra.mxu3 %vm289_vm0, %v1459_v48  ;;  %v430_v13 = vld [vmem:[%s1405_s12 + $0x4d0] sm:$0xff]  ;;  %v405_v15 = vld [vmem:[%s1405_s12 + $0x198] sm:$0xff]  ;;  %v586_v27 = vld [vmem:[%s1405_s12 + $0x620] sm:$0xff] }
  0x48   : > { %309 = vmatpush.msra.mxu0 %v243_v42  ;;  %355 = vmatpush.msra.mxu2 %v244_v43  ;;  %v404_v14 = vld [vmem:[%s1405_s12 + $0x190] sm:$0xff]  ;;  %v403_v18 = vld [vmem:[%s1405_s12 + $0x158] sm:$0xff]  ;;  %v584_v30 = vld [vmem:[%s1405_s12 + $0x5e0] sm:$0xff] }
  0x49   : > { %472 = vmatpush.msrb.mxu3 %v440_v56  ;;  %v428_v16 = vld [vmem:[%s1405_s12 + $0x490] sm:$0xff]  ;;  %v401_v21 = vld [vmem:[%s1405_s12 + $0x118] sm:$0xff]  ;;  %618 = vmatpush.msrb.mxu1 %v586_v27  ;;  %v582_v33 = vld [vmem:[%s1405_s12 + $0x5a0] sm:$0xff] }
  0x4a   : > { %310 = vmatpush.msra.mxu0 %v241_v46  ;;  %356 = vmatpush.msra.mxu2 %v242_v47  ;;  %v402_v17 = vld [vmem:[%s1405_s12 + $0x150] sm:$0xff]  ;;  %v399_v24 = vld [vmem:[%s1405_s12 + $0xd8] sm:$0xff]  ;;  %v568_v35 = vld [vmem:[%s1405_s12 + $0x3e0] sm:$0xff] }
  0x4b   : > { %473 = vmatpush.msrb.mxu3 %v438_v59  ;;  %v426_v19 = vld [vmem:[%s1405_s12 + $0x450] sm:$0xff]  ;;  %v397_v26 = vld [vmem:[%s1405_s12 + $0x98] sm:$0xff]  ;;  %619 = vmatpush.msrb.mxu1 %v584_v30  ;;  %v566_v37 = vld [vmem:[%s1405_s12 + $0x3a0] sm:$0xff] }
  0x4c   : > { %311 = vmatpush.msra.mxu0 %v239_v49  ;;  %357 = vmatpush.msra.mxu2 %v240_v50  ;;  %v400_v20 = vld [vmem:[%s1405_s12 + $0x110] sm:$0xff]  ;;  %v395_v29 = vld [vmem:[%s1405_s12 + $0x58] sm:$0xff]  ;;  %v580_v38 = vld [vmem:[%s1405_s12 + $0x560] sm:$0xff] }
  0x4d   : > { %358 = vmatmul.f32.vlgmr.msra.gmra.mxu2 %v1465_v53  ;;  %312 = vmatmul.f32.vlgmr.msra.gmra.mxu0 %v1465_v53  ;;  %v424_v22 = vld [vmem:[%s1405_s12 + $0x410] sm:$0xff]  ;;  %v393_v32 = vld [vmem:[%s1405_s12 + $0x18] sm:$0xff]  ;;  %v564_v40 = vld [vmem:[%s1405_s12 + $0x360] sm:$0xff] }
  0x4e   : > { %442 = vmatpush.msrb.mxu2 %v422_v51  ;;  %488 = vmatpush.msrb.mxu0 %v423_v52  ;;  %v398_v23 = vld [vmem:[%s1405_s12 + $0xd0] sm:$0xff]  ;;  %v441_v34 = vld [vmem:[%s1405_s12 + $0x618] sm:$0xff]  ;;  %v578_v41 = vld [vmem:[%s1405_s12 + $0x520] sm:$0xff] }
  0x4f   : > { %1120 = vmatmul.msk.f32.gmra.mxu1 %vm289_vm0, %v1481_v62  ;;  %1122 = vmatmul.msk.f32.gmra.mxu3 %vm289_vm0, %v1481_v62  ;;  %v396_v25 = vld [vmem:[%s1405_s12 + $0x90] sm:$0xff]  ;;  %v439_v36 = vld [vmem:[%s1405_s12 + $0x5d8] sm:$0xff]  ;;  %v562_v43 = vld [vmem:[%s1405_s12 + $0x320] sm:$0xff] }
  0x50   : > { %443 = vmatpush.msrb.mxu2 %v420_v54  ;;  %489 = vmatpush.msrb.mxu0 %v421_v55  ;;  %v394_v28 = vld [vmem:[%s1405_s12 + $0x50] sm:$0xff]  ;;  %v437_v39 = vld [vmem:[%s1405_s12 + $0x598] sm:$0xff]  ;;  %v576_v44 = vld [vmem:[%s1405_s12 + $0x4e0] sm:$0xff] }
  0x51   : > { %474 = vmatpush.msrb.mxu3 %v436_v4  ;;  %v392_v31 = vld [vmem:[%s1405_s12 + $0x10] sm:$0xff]  ;;  %620 = vmatpush.msrb.mxu1 %v582_v33  ;;  %v435_v42 = vld [vmem:[%s1405_s12 + $0x558] sm:$0xff]  ;;  %v560_v46 = vld [vmem:[%s1405_s12 + $0x2e0] sm:$0xff] }
  0x52   : > { %444 = vmatpush.msrb.mxu2 %v418_v57  ;;  %490 = vmatpush.msrb.mxu0 %v419_v58  ;;  %v433_v45 = vld [vmem:[%s1405_s12 + $0x518] sm:$0xff]  ;;  %v558_v49 = vld [vmem:[%s1405_s12 + $0x2a0] sm:$0xff]  ;;  %v732_v4 = vld [vmem:[%s1405_s12 + $0x630] sm:$0xff] }
  0x53   : > { %475 = vmatpush.msrb.mxu3 %v434_v7  ;;  %621 = vmatpush.msrb.mxu1 %v580_v38  ;;  %v431_v47 = vld [vmem:[%s1405_s12 + $0x4d8] sm:$0xff]  ;;  %v574_v50 = vld [vmem:[%s1405_s12 + $0x4a0] sm:$0xff]  ;;  %v565_v7 = vld [vmem:[%s1405_s12 + $0x368] sm:$0xff] }
  0x54   : > { %445 = vmatpush.msrb.mxu2 %v416_v60  ;;  %491 = vmatpush.msrb.mxu0 %v417_v61  ;;  %v429_v51 = vld [vmem:[%s1405_s12 + $0x498] sm:$0xff]  ;;  %v556_v52 = vld [vmem:[%s1405_s12 + $0x260] sm:$0xff]  ;;  %v714_v60 = vld [vmem:[%s1405_s12 + $0x3f0] sm:$0xff] }
  0x55   : > { %361 = vmatmul.f32.gmra.mxu2 %v1485_v1  ;;  %315 = vmatmul.f32.gmra.mxu0 %v1485_v1  ;;  %v572_v54 = vld [vmem:[%s1405_s12 + $0x460] sm:$0xff]  ;;  %v427_v55 = vld [vmem:[%s1405_s12 + $0x458] sm:$0xff]  ;;  %v569_v61 = vld [vmem:[%s1405_s12 + $0x3e8] sm:$0xff] }
  0x56   : > { %446 = vmatpush.msrb.mxu2 %v414_v63  ;;  %492 = vmatpush.msrb.mxu0 %v415_v0  ;;  %v554_v56 = vld [vmem:[%s1405_s12 + $0x220] sm:$0xff]  ;;  %v425_v58 = vld [vmem:[%s1405_s12 + $0x418] sm:$0xff]  ;;  %v712_v0 = vld [vmem:[%s1405_s12 + $0x3b0] sm:$0xff] }
  0x57   : > { %476 = vmatpush.msrb.mxu3 %v432_v10  ;;  %622 = vmatpush.msrb.mxu1 %v578_v41  ;;  %v570_v57 = vld [vmem:[%s1405_s12 + $0x420] sm:$0xff]  ;;  %v563_v10 = vld [vmem:[%s1405_s12 + $0x328] sm:$0xff]  ;;  %v722_v30 = vld [vmem:[%s1405_s12 + $0x4f0] sm:$0xff] }
  0x58   : > { %447 = vmatpush.msrb.mxu2 %v412_v2  ;;  %493 = vmatpush.msrb.mxu0 %v413_v3  ;;  %v552_v59 = vld [vmem:[%s1405_s12 + $0x1e0] sm:$0xff]  ;;  %v567_v2 = vld [vmem:[%s1405_s12 + $0x3a8] sm:$0xff]  ;;  %v718_v38 = vld [vmem:[%s1405_s12 + $0x470] sm:$0xff] }
  0x59   : > { %477 = vmatpush.msrb.mxu3 %v430_v13  ;;  %623 = vmatpush.msrb.mxu1 %v576_v44  ;;  %v550_v63 = vld [vmem:[%s1405_s12 + $0x1a0] sm:$0xff]  ;;  %v561_v13 = vld [vmem:[%s1405_s12 + $0x2e8] sm:$0xff]  ;;  %v694_v41 = vld [vmem:[%s1405_s12 + $0x170] sm:$0xff] }
  0x5a   : > { %448 = vmatpush.msrb.mxu2 %v410_v5  ;;  %494 = vmatpush.msrb.mxu0 %v411_v6  ;;  %v548_v3 = vld [vmem:[%s1405_s12 + $0x160] sm:$0xff]  ;;  %v710_v5 = vld [vmem:[%s1405_s12 + $0x370] sm:$0xff]  ;;  %v553_v27 = vld [vmem:[%s1405_s12 + $0x1e8] sm:$0xff] }
  0x5b   : > { %478 = vmatpush.msrb.mxu3 %v428_v16  ;;  %624 = vmatpush.msrb.mxu1 %v574_v50  ;;  %v730_v6 = vld [vmem:[%s1405_s12 + $0x5f0] sm:$0xff]  ;;  %v581_v33 = vld [vmem:[%s1405_s12 + $0x568] sm:$0xff] }
  0x5c   : > { %449 = vmatpush.msrb.mxu2 %v408_v8  ;;  %495 = vmatpush.msrb.mxu0 %v409_v9  ;;  %v546_v8 = vld [vmem:[%s1405_s12 + $0x120] sm:$0xff]  ;;  %v728_v9 = vld [vmem:[%s1405_s12 + $0x5b0] sm:$0xff]  ;;  %v575_v44 = vld [vmem:[%s1405_s12 + $0x4a8] sm:$0xff] }
  0x5d   : > { %479 = vmatpush.msrb.mxu3 %v426_v19  ;;  %625 = vmatpush.msrb.mxu1 %v572_v54  ;;  %v726_v16 = vld [vmem:[%s1405_s12 + $0x570] sm:$0xff]  ;;  %v541_v50 = vld [vmem:[%s1405_s12 + $0x68] sm:$0xff] }
  0x5e   : > { %450 = vmatpush.msrb.mxu2 %v406_v11  ;;  %496 = vmatpush.msrb.mxu0 %v407_v12  ;;  %v544_v11 = vld [vmem:[%s1405_s12 + $0xe0] sm:$0xff]  ;;  %v708_v12 = vld [vmem:[%s1405_s12 + $0x330] sm:$0xff]  ;;  %v539_v54 = vld [vmem:[%s1405_s12 + $0x28] sm:$0xff] }
  0x5f   : > { %480 = vmatpush.msrb.mxu3 %v424_v22  ;;  %626 = vmatpush.msrb.mxu1 %v570_v57  ;;  %v704_v19 = vld [vmem:[%s1405_s12 + $0x2b0] sm:$0xff]  ;;  %v538_v22 = vld [vmem:[%s1405_s12 + $0x20] sm:$0xff]  ;;  %v733_v57 = vld [vmem:[%s1405_s12 + $0x638] sm:$0xff] }
  0x60   : > { %451 = vmatpush.msrb.mxu2 %v404_v14  ;;  %497 = vmatpush.msrb.mxu0 %v405_v15  ;;  %v542_v14 = vld [vmem:[%s1405_s12 + $0xa0] sm:$0xff]  ;;  %v706_v15 = vld [vmem:[%s1405_s12 + $0x2f0] sm:$0xff] }
  0x61   : > { %1123 = vmatmul.msk.f32.vlgmr.msrb.gmra.mxu3 %vm289_vm0, %v1459_v48  ;;  %734 = vmatpush.msra.mxu1 %v714_v60  ;;  %v711_v60 = vld [vmem:[%s1405_s12 + $0x378] sm:$0xff] }
  0x62   : > { %452 = vmatpush.msrb.mxu2 %v402_v17  ;;  %498 = vmatpush.msrb.mxu0 %v403_v18  ;;  %v559_v17 = vld [vmem:[%s1405_s12 + $0x2a8] sm:$0xff]  ;;  %v540_v18 = vld [vmem:[%s1405_s12 + $0x60] sm:$0xff] }
  0x63   : > { %735 = vmatpush.msra.mxu1 %v712_v0  ;;  %764 = vmatpush.msra.mxu3 %v732_v4  ;;  %v709_v0 = vld [vmem:[%s1405_s12 + $0x338] sm:$0xff] }
  0x64   : > { %453 = vmatpush.msrb.mxu2 %v400_v20  ;;  %499 = vmatpush.msrb.mxu0 %v401_v21  ;;  %v724_v20 = vld [vmem:[%s1405_s12 + $0x530] sm:$0xff]  ;;  %v557_v21 = vld [vmem:[%s1405_s12 + $0x268] sm:$0xff]  ;;  %v707_v4 = vld [vmem:[%s1405_s12 + $0x2f8] sm:$0xff] }
  0x65   : > { %736 = vmatpush.msra.mxu1 %v710_v5  ;;  %765 = vmatpush.msra.mxu3 %v730_v6  ;;  %v727_v5 = vld [vmem:[%s1405_s12 + $0x578] sm:$0xff] }
  0x66   : > { %454 = vmatpush.msrb.mxu2 %v398_v23  ;;  %500 = vmatpush.msrb.mxu0 %v399_v24  ;;  %v587_v23 = vld [vmem:[%s1405_s12 + $0x628] sm:$0xff]  ;;  %v702_v24 = vld [vmem:[%s1405_s12 + $0x270] sm:$0xff]  ;;  %v705_v6 = vld [vmem:[%s1405_s12 + $0x2b8] sm:$0xff] }
  0x67   : > { %1127 = vmatmul.msk.f32.vlgmr.msrb.gmra.mxu1 %vm289_vm0, %v1459_v48  ;;  %766 = vmatpush.msra.mxu3 %v728_v9  ;;  %v877_v9 = vld [vmem:[%s1797_s2 + $0xf8] sm:$0xff] }
  0x68   : > { %455 = vmatpush.msrb.mxu2 %v396_v25  ;;  %501 = vmatpush.msrb.mxu0 %v397_v26  ;;  %v555_v25 = vld [vmem:[%s1405_s12 + $0x228] sm:$0xff] }
  0x69   : > { %1124 = vmatmul.msk.f32.gmra.mxu3 %vm289_vm0, %v1481_v62  ;;  %737 = vmatpush.msra.mxu1 %v708_v12  ;;  %v585_v26 = vld [vmem:[%s1405_s12 + $0x5e8] sm:$0xff]  ;;  %v858_v12 = vld [vmem:[%s1797_s2 + $0x60] sm:$0xff] }
  0x6a   : > { %456 = vmatpush.msrb.mxu2 %v394_v28  ;;  %502 = vmatpush.msrb.mxu0 %v395_v29  ;;  %v700_v28 = vld [vmem:[%s1405_s12 + $0x230] sm:$0xff]  ;;  %v583_v29 = vld [vmem:[%s1405_s12 + $0x5a8] sm:$0xff] }
  0x6b   : > { %738 = vmatpush.msra.mxu1 %v706_v15  ;;  %767 = vmatpush.msra.mxu3 %v726_v16  ;;  %v721_v15 = vld [vmem:[%s1405_s12 + $0x4b8] sm:$0xff] }
  0x6c   : > { %457 = vmatpush.msrb.mxu2 %v392_v31  ;;  %503 = vmatpush.msrb.mxu0 %v393_v32  ;;  %v551_v31 = vld [vmem:[%s1405_s12 + $0x1a8] sm:$0xff]  ;;  %v698_v32 = vld [vmem:[%s1405_s12 + $0x1f0] sm:$0xff]  ;;  %v857_v16 = vld [vmem:[%s1797_s2 + $0x58] sm:$0xff] }
  0x6d   : > { %458 = vmatmul.f32.vlgmr.msrb.gmra.mxu2 %v1465_v53  ;;  %504 = vmatmul.f32.vlgmr.msrb.gmra.mxu0 %v1465_v53 }
  0x6e   : > { %518 = vmatpush.msra.mxu2 %v441_v34  ;;  %588 = vmatpush.msra.mxu0 %v568_v35  ;;  %v720_v34 = vld [vmem:[%s1405_s12 + $0x4b0] sm:$0xff]  ;;  %v549_v35 = vld [vmem:[%s1405_s12 + $0x168] sm:$0xff] }
  0x6f   : > { %739 = vmatpush.msra.mxu1 %v704_v19  ;;  %768 = vmatpush.msra.mxu3 %v724_v20  ;;  %v856_v19 = vld [vmem:[%s1797_s2 + $0x50] sm:$0xff]  ;;  %v875_v20 = vld [vmem:[%s1797_s2 + $0xe8] sm:$0xff] }
  0x70   : > { %519 = vmatpush.msra.mxu2 %v439_v36  ;;  %589 = vmatpush.msra.mxu0 %v566_v37  ;;  %v696_v36 = vld [vmem:[%s1405_s12 + $0x1b0] sm:$0xff]  ;;  %v579_v37 = vld [vmem:[%s1405_s12 + $0x528] sm:$0xff] }
  0x71   : > { %740 = vmatpush.msra.mxu1 %v702_v24  ;;  %769 = vmatpush.msra.mxu3 %v722_v30  ;;  %v695_v24 = vld [vmem:[%s1405_s12 + $0x178] sm:$0xff] }
  0x72   : > { %520 = vmatpush.msra.mxu2 %v437_v39  ;;  %590 = vmatpush.msra.mxu0 %v564_v40  ;;  %v547_v39 = vld [vmem:[%s1405_s12 + $0x128] sm:$0xff]  ;;  %v691_v30 = vld [vmem:[%s1405_s12 + $0xf8] sm:$0xff] }
  0x73   : > { %1128 = vmatmul.msk.f32.gmra.mxu1 %vm289_vm0, %v1481_v62  ;;  %770 = vmatpush.msra.mxu3 %v720_v34  ;;  %v577_v40 = vld [vmem:[%s1405_s12 + $0x4e8] sm:$0xff] }
  0x74   : > { %521 = vmatpush.msra.mxu2 %v435_v42  ;;  %591 = vmatpush.msra.mxu0 %v562_v43  ;;  %v545_v42 = vld [vmem:[%s1405_s12 + $0xe8] sm:$0xff]  ;;  %v716_v43 = vld [vmem:[%s1405_s12 + $0x430] sm:$0xff] }
  0x75   : > { %461 = vmatmul.f32.gmra.mxu2 %v1485_v1  ;;  %507 = vmatmul.f32.gmra.mxu0 %v1485_v1  ;;  %v851_v34 = vld [vmem:[%s1797_s2 + $0x28] sm:$0xff] }
  0x76   : > { %522 = vmatpush.msra.mxu2 %v433_v45  ;;  %592 = vmatpush.msra.mxu0 %v560_v46  ;;  %v692_v45 = vld [vmem:[%s1405_s12 + $0x130] sm:$0xff]  ;;  %v543_v46 = vld [vmem:[%s1405_s12 + $0xa8] sm:$0xff] }
  0x77   : > { %741 = vmatpush.msra.mxu1 %v700_v28  ;;  %771 = vmatpush.msra.mxu3 %v718_v38  ;;  %v873_v28 = vld [vmem:[%s1797_s2 + $0xd8] sm:$0xff] }
  0x78   : > { %523 = vmatpush.msra.mxu2 %v431_v47  ;;  %593 = vmatpush.msra.mxu0 %v558_v49  ;;  %v573_v47 = vld [vmem:[%s1405_s12 + $0x468] sm:$0xff]  ;;  %v690_v49 = vld [vmem:[%s1405_s12 + $0xf0] sm:$0xff]  ;;  %v685_v38 = vld [vmem:[%s1405_s12 + $0x38] sm:$0xff] }
  0x79   : > { %742 = vmatpush.msra.mxu1 %v698_v32  ;;  %772 = vmatpush.msra.mxu3 %v716_v43  ;;  %v689_v32 = vld [vmem:[%s1405_s12 + $0xb8] sm:$0xff]  ;;  %v847_v43 = vld [vmem:[%s1797_s2 + $0x8] sm:$0xff] }
  0x7a   : > { %524 = vmatpush.msra.mxu2 %v429_v51  ;;  %594 = vmatpush.msra.mxu0 %v556_v52  ;;  %v571_v51 = vld [vmem:[%s1405_s12 + $0x428] sm:$0xff]  ;;  %v688_v52 = vld [vmem:[%s1405_s12 + $0xb0] sm:$0xff] }
  0x7b   : > { %743 = vmatpush.msra.mxu1 %v696_v36  ;;  %1131 = vmatmul.msk.f32.vlgmr.msra.gmra.mxu3 %vm289_vm0, %v1459_v48  ;;  %v870_v36 = vld [vmem:[%s1797_s2 + $0xc0] sm:$0xff] }
  0x7c   : > { %525 = vmatpush.msra.mxu2 %v427_v55  ;;  %595 = vmatpush.msra.mxu0 %v554_v56  ;;  %v715_v55 = vld [vmem:[%s1405_s12 + $0x3f8] sm:$0xff] }
  0x7d   : > { %744 = vmatpush.msra.mxu1 %v694_v41  ;;  %v713_v56 = vld [vmem:[%s1405_s12 + $0x3b8] sm:$0xff]  ;;  %v868_v41 = vld [vmem:[%s1797_s2 + $0xb0] sm:$0xff] }
  0x7e   : > { %526 = vmatpush.msra.mxu2 %v425_v58  ;;  %596 = vmatpush.msra.mxu0 %v552_v59  ;;  %v686_v58 = vld [vmem:[%s1405_s12 + $0x70] sm:$0xff]  ;;  %v861_v59 = vld [vmem:[%s1797_s2 + $0x78] sm:$0xff] }
  0x7f   : > { %1125 = vmatmul.msk.f32.vlgmr.msra.gmra.mxu2 %vm289_vm0, %v1459_v48  ;;  %745 = vmatpush.msra.mxu1 %v692_v45  ;;  %v865_v45 = vld [vmem:[%s1797_s2 + $0x98] sm:$0xff] }
  0x80   : > { %634 = vmatpush.msrb.mxu2 %v569_v61  ;;  %597 = vmatpush.msra.mxu0 %v550_v63  ;;  %v731_v61 = vld [vmem:[%s1405_s12 + $0x5f8] sm:$0xff]  ;;  %v684_v63 = vld [vmem:[%s1405_s12 + $0x30] sm:$0xff] }
  0x81   : > { %746 = vmatpush.msra.mxu1 %v690_v49  ;;  %878 = vmatpush.msrb.mxu3 %v861_v59  ;;  %v862_v49 = vld [vmem:[%s1797_s2 + $0x80] sm:$0xff] }
  0x82   : > { %635 = vmatpush.msrb.mxu2 %v567_v2  ;;  %598 = vmatpush.msra.mxu0 %v548_v3  ;;  %v729_v2 = vld [vmem:[%s1405_s12 + $0x5b8] sm:$0xff]  ;;  %v860_v3 = vld [vmem:[%s1797_s2 + $0x70] sm:$0xff] }
  0x83   : > { %747 = vmatpush.msra.mxu1 %v688_v52  ;;  %1132 = vmatmul.msk.f32.gmra.mxu3 %vm289_vm0, %v1481_v62 }
  0x84   : > { %636 = vmatpush.msrb.mxu2 %v565_v7  ;;  %599 = vmatpush.msra.mxu0 %v546_v8  ;;  %v725_v7 = vld [vmem:[%s1405_s12 + $0x538] sm:$0xff]  ;;  %v859_v8 = vld [vmem:[%s1797_s2 + $0x68] sm:$0xff] }
  0x85   : > { %748 = vmatpush.msra.mxu1 %v686_v58  ;;  %879 = vmatpush.msrb.mxu3 %v860_v3 }
  0x86   : > { %637 = vmatpush.msrb.mxu2 %v563_v10  ;;  %600 = vmatpush.msra.mxu0 %v544_v11  ;;  %v703_v10 = vld [vmem:[%s1405_s12 + $0x278] sm:$0xff] }
  0x87   : > { %1126 = vmatmul.msk.f32.gmra.mxu2 %vm289_vm0, %v1481_v62  ;;  %749 = vmatpush.msra.mxu1 %v684_v63  ;;  %v723_v11 = vld [vmem:[%s1405_s12 + $0x4f8] sm:$0xff] }
  0x88   : > { %638 = vmatpush.msrb.mxu2 %v561_v13  ;;  %601 = vmatpush.msra.mxu0 %v542_v14  ;;  %v876_v13 = vld [vmem:[%s1797_s2 + $0xf0] sm:$0xff]  ;;  %v701_v14 = vld [vmem:[%s1405_s12 + $0x238] sm:$0xff] }
  0x89   : > { %750 = vmatmul.f32.vlgmr.msra.gmra.mxu1 %v1465_v53  ;;  %880 = vmatpush.msrb.mxu3 %v859_v8 }
  0x8a   : > { %639 = vmatpush.msrb.mxu2 %v559_v17  ;;  %602 = vmatpush.msra.mxu0 %v540_v18  ;;  %v699_v17 = vld [vmem:[%s1405_s12 + $0x1f8] sm:$0xff] }
  0x8b   : > { %919 = vmatpush.msrb.mxu1 %v877_v9  ;;  %v719_v18 = vld [vmem:[%s1405_s12 + $0x478] sm:$0xff]  ;;  %881 = vmatpush.msrb.mxu3 %v858_v12 }
  0x8c   : > { %640 = vmatpush.msrb.mxu2 %v557_v21  ;;  %603 = vmatpush.msra.mxu0 %v538_v22  ;;  %v697_v21 = vld [vmem:[%s1405_s12 + $0x1b8] sm:$0xff] }
  0x8d   : > { %604 = vmatmul.f32.vlgmr.msra.gmra.mxu0 %v1465_v53  ;;  %920 = vmatpush.msrb.mxu1 %v876_v13  ;;  %v717_v22 = vld [vmem:[%s1405_s12 + $0x438] sm:$0xff] }
  0x8e   : > { %664 = vmatpush.msrb.mxu0 %v587_v23  ;;  %641 = vmatpush.msrb.mxu2 %v555_v25  ;;  %v855_v23 = vld [vmem:[%s1797_s2 + $0x48] sm:$0xff]  ;;  %v874_v25 = vld [vmem:[%s1797_s2 + $0xe0] sm:$0xff] }
  0x8f   : > { %882 = vmatpush.msrb.mxu3 %v857_v16  ;;  %921 = vmatpush.msrb.mxu1 %v875_v20 }
  0x90   : > { %665 = vmatpush.msrb.mxu0 %v585_v26  ;;  %642 = vmatpush.msrb.mxu2 %v553_v27  ;;  %v854_v26 = vld [vmem:[%s1797_s2 + $0x40] sm:$0xff]  ;;  %v693_v27 = vld [vmem:[%s1405_s12 + $0x138] sm:$0xff] }
  0x91   : > { %753 = vmatmul.f32.gmra.mxu1 %v1485_v1  ;;  %883 = vmatpush.msrb.mxu3 %v856_v19 }
  0x92   : > { %666 = vmatpush.msrb.mxu0 %v583_v29  ;;  %643 = vmatpush.msrb.mxu2 %v551_v31  ;;  %v853_v29 = vld [vmem:[%s1797_s2 + $0x38] sm:$0xff]  ;;  %v872_v31 = vld [vmem:[%s1797_s2 + $0xd0] sm:$0xff] }
  0x93   : > { %884 = vmatpush.msrb.mxu3 %v855_v23  ;;  %922 = vmatpush.msrb.mxu1 %v874_v25 }
  0x94   : > { %667 = vmatpush.msrb.mxu0 %v581_v33  ;;  %644 = vmatpush.msrb.mxu2 %v549_v35  ;;  %v871_v33 = vld [vmem:[%s1797_s2 + $0xc8] sm:$0xff]  ;;  %v687_v35 = vld [vmem:[%s1405_s12 + $0x78] sm:$0xff] }
  0x95   : > { %607 = vmatmul.f32.gmra.mxu0 %v1485_v1  ;;  %885 = vmatpush.msrb.mxu3 %v854_v26 }
  0x96   : > { %668 = vmatpush.msrb.mxu0 %v579_v37  ;;  %645 = vmatpush.msrb.mxu2 %v547_v39  ;;  %v850_v37 = vld [vmem:[%s1797_s2 + $0x20] sm:$0xff]  ;;  %v869_v39 = vld [vmem:[%s1797_s2 + $0xb8] sm:$0xff] }
  0x97   : > { %923 = vmatpush.msrb.mxu1 %v873_v28  ;;  %886 = vmatpush.msrb.mxu3 %v853_v29 }
  0x98   : > { %669 = vmatpush.msrb.mxu0 %v577_v40  ;;  %646 = vmatpush.msrb.mxu2 %v545_v42  ;;  %v849_v40 = vld [vmem:[%s1797_s2 + $0x18] sm:$0xff]  ;;  %v867_v42 = vld [vmem:[%s1797_s2 + $0xa8] sm:$0xff] }
  0x99   : > { %924 = vmatpush.msrb.mxu1 %v872_v31 }
  0x9a   : > { %670 = vmatpush.msrb.mxu0 %v575_v44  ;;  %647 = vmatpush.msrb.mxu2 %v543_v46  ;;  %v866_v44 = vld [vmem:[%s1797_s2 + $0xa0] sm:$0xff]  ;;  %v864_v46 = vld [vmem:[%s1797_s2 + $0x90] sm:$0xff] }
  0x9b   : > { %925 = vmatpush.msrb.mxu1 %v871_v33 }
  0x9c   : > { %671 = vmatpush.msrb.mxu0 %v573_v47  ;;  %648 = vmatpush.msrb.mxu2 %v541_v50  ;;  %v863_v47 = vld [vmem:[%s1797_s2 + $0x88] sm:$0xff] }
  0x9d   : > { %926 = vmatpush.msrb.mxu1 %v870_v36 }
  0x9e   : > { %672 = vmatpush.msrb.mxu0 %v571_v51  ;;  %649 = vmatpush.msrb.mxu2 %v539_v54 }
  0x9f   : > { %650 = vmatmul.f32.vlgmr.msrb.gmra.mxu2 %v1465_v53  ;;  %1129 = vmatmul.msk.f32.vlgmr.msrb.gmra.mxu0 %vm289_vm0, %v1459_v48 }
  0xa0   : > { %780 = vmatpush.msra.mxu0 %v715_v55  ;;  %810 = vmatpush.msra.mxu2 %v733_v57 }
  0xa1   : > { %927 = vmatpush.msrb.mxu1 %v869_v39 }
  0xa2   : > { %781 = vmatpush.msra.mxu0 %v713_v56  ;;  %811 = vmatpush.msra.mxu2 %v731_v61 }
  0xa3   : > { %928 = vmatpush.msrb.mxu1 %v868_v41 }
  0xa4   : > { %782 = vmatpush.msra.mxu0 %v711_v60  ;;  %812 = vmatpush.msra.mxu2 %v729_v2 }
  0xa5   : > { %929 = vmatpush.msrb.mxu1 %v867_v42 }
  0xa6   : > { %783 = vmatpush.msra.mxu0 %v709_v0  ;;  %813 = vmatpush.msra.mxu2 %v727_v5 }
  0xa7   : > { %653 = vmatmul.f32.gmra.mxu2 %v1485_v1  ;;  %1130 = vmatmul.msk.f32.gmra.mxu0 %vm289_vm0, %v1481_v62 }
  0xa8   : > { %784 = vmatpush.msra.mxu0 %v707_v4  ;;  %814 = vmatpush.msra.mxu2 %v725_v7 }
  0xa9   : > { %930 = vmatpush.msrb.mxu1 %v866_v44 }
  0xaa   : > { %785 = vmatpush.msra.mxu0 %v705_v6  ;;  %815 = vmatpush.msra.mxu2 %v723_v11 }
  0xab   : > { %931 = vmatpush.msrb.mxu1 %v865_v45 }
  0xac   : > { %786 = vmatpush.msra.mxu0 %v703_v10  ;;  %816 = vmatpush.msra.mxu2 %v721_v15 }
  0xad   : > { %932 = vmatpush.msrb.mxu1 %v864_v46 }
  0xae   : > { %787 = vmatpush.msra.mxu0 %v701_v14  ;;  %817 = vmatpush.msra.mxu2 %v719_v18 }
  0xaf   : > { %933 = vmatpush.msrb.mxu1 %v863_v47 }
  0xb0   : > { %788 = vmatpush.msra.mxu0 %v699_v17  ;;  %818 = vmatpush.msra.mxu2 %v717_v22 }
  0xb1   : > { %1133 = vmatmul.msk.f32.vlgmr.msra.gmra.mxu2 %vm289_vm0, %v1459_v48  ;;  %v852_v48 = vld [vmem:[%s1797_s2 + $0x30] sm:$0xff]  ;;  %934 = vmatpush.msrb.mxu1 %v862_v49 }
  0xb2   : > { %789 = vmatpush.msra.mxu0 %v697_v21  ;;  %887 = vmatpush.msrb.mxu3 %v852_v48 }
  0xb4   : > { %790 = vmatpush.msra.mxu0 %v695_v24  ;;  %888 = vmatpush.msrb.mxu3 %v851_v34 }
  0xb6   : > { %791 = vmatpush.msra.mxu0 %v693_v27  ;;  %889 = vmatpush.msrb.mxu3 %v850_v37 }
  0xb8   : > { %792 = vmatpush.msra.mxu0 %v691_v30  ;;  %890 = vmatpush.msrb.mxu3 %v849_v40 }
  0xb9   : > { %1134 = vmatmul.msk.f32.gmra.mxu2 %vm289_vm0, %v1481_v62  ;;  %v848_v62 = vld [vmem:[%s1797_s2 + $0x10] sm:$0xff] }
  0xba   : > { %793 = vmatpush.msra.mxu0 %v689_v32  ;;  %891 = vmatpush.msrb.mxu3 %v848_v62 }
  0xbc   : > { %794 = vmatpush.msra.mxu0 %v687_v35  ;;  %892 = vmatpush.msrb.mxu3 %v847_v43 }
  0xbe   : > { %795 = vmatpush.msra.mxu0 %v685_v38 }
  0xbf   : > { %796 = vmatmul.f32.vlgmr.msra.gmra.mxu0 %v1465_v53  ;;  %v846_v53 = vld [vmem:[%s1797_s2] sm:$0xff] }
  0xc0   : > { %893 = vmatpush.msrb.mxu3 %v846_v53 }
  0xc4   : > { %v336_v50 = vpop.f32.mrf.mxu1 }
  0xc7   : > { %799 = vmatmul.f32.gmra.mxu0 %v1485_v1 }
  0xca   : > { %v313_v51 = vpop.f32.mrf.mxu0  ;;  %v382_v54 = vpop.f32.mrf.mxu3 }
  0xcb   : > { %v337_v52 = vadd.f32 %v336_v50, %v313_v51  ;;  %v960_v51 = vld [vmem:[%s1798_s3] sm:$0xff] }
  0xcc   : > { %v339_v56 = vpop.f32.mrf.mxu1 }
  0xcd   : > { %894 = vmatmul.f32.vlgmr.msrb.gmra.mxu3 %v337_v52  ;;  %v961_v52 = vld [vmem:[%s1798_s3 + $0x8] sm:$0xff] }
  0xd0   : > { %v359_v55 = vpop.f32.mrf.mxu2 }
  0xd1   : > { %v383_v57 = vadd.f32 %v382_v54, %v359_v55 }
  0xd2   : > { %v316_v1 = vpop.f32.mrf.mxu0  ;;  %v385_v59 = vpop.f32.mrf.mxu3 }
  0xd3   : > { %v340_v58 = vadd.f32 %v339_v56, %v316_v1  ;;  %935 = vmatmul.f32.vlgmr.msrb.gmra.mxu1 %v383_v57 }
  0xd5   : > { %897 = vmatmul.f32.gmra.mxu3 %v340_v58 }
  0xd8   : > { %v362_v60 = vpop.f32.mrf.mxu2 }
  0xd9   : > { %v386_v61 = vadd.f32 %v385_v59, %v362_v60 }
  0xdb   : > { %938 = vmatmul.f32.gmra.mxu1 %v386_v61 }
  0xe4   : > { %v482_v63 = vpop.f32.mrf.mxu3  ;;  %v628_v10 = vpop.f32.mrf.mxu1 }
  0xea   : > { %v505_v3 = vpop.f32.mrf.mxu0 }
  0xec   : > { %v485_v4 = vpop.f32.mrf.mxu3 }
  0xf0   : > { %v459_v0 = vpop.f32.mrf.mxu2  ;;  %v631_v15 = vpop.f32.mrf.mxu1 }
  0xf1   : > { %v483_v2 = vadd.f32 %v482_v63, %v459_v0 }
  0xf2   : > { %v508_v7 = vpop.f32.mrf.mxu0 }
  0xf3   : > { %900 = vmatmul.f32.gmra.mxu3 %v483_v2 }
  0xf8   : > { %v462_v5 = vpop.f32.mrf.mxu2 }
  0xf9   : > { %v486_v6 = vadd.f32 %v485_v4, %v462_v5 }
  0xfb   : > { %903 = vmatmul.f32.gmra.mxu3 %v486_v6 }
  0xfe   : > { %v774_v19 = vpop.f32.mrf.mxu3 }
 0x102   : > { %v528_v8 = vpop.f32.mrf.mxu2 }
 0x103   : > { %v529_v9 = vadd.f32 %v528_v8, %v505_v3 }
 0x105   : > { %941 = vmatmul.f32.gmra.mxu1 %v529_v9 }
 0x106   : > { %v751_v21 = vpop.f32.mrf.mxu1  ;;  %v777_v25 = vpop.f32.mrf.mxu3 }
 0x107   : > { %v775_v23 = vadd.f32 %v774_v19, %v751_v21 }
 0x10a   : > { %v531_v11 = vpop.f32.mrf.mxu2  ;;  %v605_v13 = vpop.f32.mrf.mxu0 }
 0x10b   : > { %v532_v12 = vadd.f32 %v531_v11, %v508_v7  ;;  %v629_v14 = vadd.f32 %v628_v10, %v605_v13 }
 0x10d   : > { %944 = vmatmul.f32.gmra.mxu1 %v532_v12  ;;  %906 = vmatmul.f32.gmra.mxu3 %v629_v14 }
 0x10e   : > { %v754_v27 = vpop.f32.mrf.mxu1 }
 0x10f   : > { %v778_v29 = vadd.f32 %v777_v25, %v754_v27 }
 0x112   : > { %v608_v16 = vpop.f32.mrf.mxu0 }
 0x113   : > { %v632_v17 = vadd.f32 %v631_v15, %v608_v16 }
 0x115   : > { %909 = vmatmul.f32.gmra.mxu3 %v632_v17 }
 0x11c   : > { %v674_v18 = vpop.f32.mrf.mxu0 }
 0x11d   : > { %912 = vmatmul.f32.gmra.mxu3 %v775_v23 }
 0x122   : > { %v651_v20 = vpop.f32.mrf.mxu2 }
 0x123   : > { %v675_v22 = vadd.f32 %v674_v18, %v651_v20 }
 0x124   : > { %v677_v24 = vpop.f32.mrf.mxu0 }
 0x125   : > { %947 = vmatmul.f32.gmra.mxu1 %v675_v22  ;;  %915 = vmatmul.f32.gmra.mxu3 %v778_v29 }
 0x12a   : > { %v654_v26 = vpop.f32.mrf.mxu2 }
 0x12b   : > { %v678_v28 = vadd.f32 %v677_v24, %v654_v26 }
 0x12d   : > { %950 = vmatmul.f32.gmra.mxu1 %v678_v28 }
 0x134   : > { %v820_v30 = vpop.f32.mrf.mxu2 }
 0x13c   : > { %v797_v31 = vpop.f32.mrf.mxu0  ;;  %v823_v32 = vpop.f32.mrf.mxu2 }
 0x13d   : > { %v821_v48 = vadd.f32 %v820_v30, %v797_v31 }
 0x13f   : > { %953 = vmatmul.f32.gmra.mxu1 %v821_v48 }
 0x144   : > { %v800_v33 = vpop.f32.mrf.mxu0 }
 0x145   : > { %v824_v34 = vadd.f32 %v823_v32, %v800_v33 }
 0x147   : > { %956 = vmatmul.f32.gmra.mxu1 %v824_v34 }
 0x150   : > { %v895_v35 = vpop.f32.mrf.mxu3  ;;  %v936_v36 = vpop.f32.mrf.mxu1 }
 0x151   : > { %v937_v49 = vadd.f32 %v936_v36, %v895_v35 }
 0x153   : > { %v962_v1 = vadd.f32 %v960_v51, %v937_v49 }
 0x155   : > { %v971_v2 = vsel %vm970_vm1, %v962_v1, -inf }
 0x158   : > { %v898_v37 = vpop.f32.mrf.mxu3  ;;  %v939_v38 = vpop.f32.mrf.mxu1 }
 0x159   : > { %v940_v50 = vadd.f32 %v939_v38, %v898_v37 }
 0x15b   : > { %v963_v58 = vadd.f32 %v961_v52, %v940_v50 }
 0x15d   : > { %v972_v3 = vsel %vm970_vm1, %v963_v58, -inf }
 0x15e   : > { %v973_v7 = vmax.f32 %v971_v2, %v972_v3 }
 0x160   : > { %v974_v11 = vrot.slane %v973_v7, 4 }
 0x162   : > { %v975_v16 = vmax.f32 %v973_v7, %v974_v11 }
 0x164   : > { %v976_v23 = vrot.slane %v975_v16, 2 }
 0x166   : > { %v977_v29 = vmax.f32 %v975_v16, %v976_v23 }
 0x168   : > { %v978_v33 = vrot.slane %v977_v29, 1 }
 0x16a   : > { %v979_v38 = vmax.f32 %v977_v29, %v978_v33 }
 0x176   : > { %v901_v39 = vpop.f32.mrf.mxu3 }
 0x17e   : > { %v904_v41 = vpop.f32.mrf.mxu3 }
 0x182   : > { %v942_v40 = vpop.f32.mrf.mxu1 }
 0x183   : > { %v943_v45 = vadd.f32 %v942_v40, %v901_v39 }
 0x185   : > { %v964_v55 = vadd.f32 %v960_v51, %v943_v45 }
 0x187   : > { %v980_v60 = vsel %vm970_vm1, %v964_v55, -inf }
 0x18a   : > { %v945_v62 = vpop.f32.mrf.mxu1 }
 0x18b   : > { %v946_v46 = vadd.f32 %v945_v62, %v904_v41 }
 0x18d   : > { %v965_v56 = vadd.f32 %v961_v52, %v946_v46 }
 0x18f   : > { %v981_v61 = vsel %vm970_vm1, %v965_v56, -inf }
 0x190   : > { %v907_v42 = vpop.f32.mrf.mxu3  ;;  %v982_v4 = vmax.f32 %v980_v60, %v981_v61 }
 0x192   : > { %v983_v9 = vrot.slane %v982_v4, 4 }
 0x194   : > { %v984_v13 = vmax.f32 %v982_v4, %v983_v9 }
 0x196   : > { %v985_v20 = vrot.slane %v984_v13, 2 }
 0x198   : > { %v910_v44 = vpop.f32.mrf.mxu3  ;;  %v986_v26 = vmax.f32 %v984_v13, %v985_v20 }
 0x19a   : > { %v987_v31 = vrot.slane %v986_v26, 1 }
 0x19c   : > { %v988_v35 = vmax.f32 %v986_v26, %v987_v31 }
 0x19e   : > { %v1014_v41 = vsel %vm1013_vm2, %v988_v35, %v979_v38 }
 0x1a0   : > { %v913_v0 = vpop.f32.mrf.mxu3 }
 0x1a2   : > { %v948_v43 = vpop.f32.mrf.mxu1 }
 0x1a3   : > { %v949_v54 = vadd.f32 %v948_v43, %v907_v42 }
 0x1a5   : > { %v966_v59 = vadd.f32 %v960_v51, %v949_v54 }
 0x1a7   : > { %v989_v5 = vsel %vm970_vm1, %v966_v59, -inf }
 0x1a8   : > { %v916_v14 = vpop.f32.mrf.mxu3 }
 0x1aa   : > { %v951_v53 = vpop.f32.mrf.mxu1 }
 0x1ab   : > { %v952_v47 = vadd.f32 %v951_v53, %v910_v44  ;;  %v1007_v53 = vlaneseq }
 0x1ad   : > { %v967_v57 = vadd.f32 %v961_v52, %v952_v47  ;;  %v1008_v46 = vand.u32 127, %v1007_v53 }
 0x1af   : > { %v990_v63 = vsel %vm970_vm1, %v967_v57, -inf  ;;  %vm1024_vm7 = vcmp.eq.s32.totalorder %v1008_v46, 0  ;;  %vm1030_vm8 = vcmp.eq.s32.totalorder %v1008_v46, 1 }
 0x1b0   : > { %v991_v6 = vmax.f32 %v989_v5, %v990_v63 }
 0x1b2   : > { %v992_v10 = vrot.slane %v991_v6, 4 }
 0x1b4   : > { %v993_v15 = vmax.f32 %v991_v6, %v992_v10 }
 0x1b6   : > { %v994_v21 = vrot.slane %v993_v15, 2 }
 0x1b8   : > { %v995_v28 = vmax.f32 %v993_v15, %v994_v21 }
 0x1ba   : > { %v996_v32 = vrot.slane %v995_v28, 1 }
 0x1bc   : > { %v954_v8 = vpop.f32.mrf.mxu1  ;;  %v997_v37 = vmax.f32 %v995_v28, %v996_v32 }
 0x1bd   : > { %v955_v12 = vadd.f32 %v954_v8, %v913_v0 }
 0x1be   : > { %v1016_v62 = vsel %vm1015_vm3, %v997_v37, %v1014_v41 }
 0x1bf   : > { %v968_v18 = vadd.f32 %v960_v51, %v955_v12 }
 0x1c1   : > { %v998_v24 = vsel %vm970_vm1, %v968_v18, -inf }
 0x1c4   : > { %v957_v17 = vpop.f32.mrf.mxu1 }
 0x1c5   : > { %v958_v19 = vadd.f32 %v957_v17, %v916_v14 }
 0x1c7   : > { %v969_v22 = vadd.f32 %v961_v52, %v958_v19 }
 0x1c9   : > { %v999_v25 = vsel %vm970_vm1, %v969_v22, -inf }
 0x1ca   : > { %v1000_v27 = vmax.f32 %v998_v24, %v999_v25 }
 0x1cc   : > { %v1001_v30 = vrot.slane %v1000_v27, 4 }
 0x1ce   : > { %v1002_v48 = vmax.f32 %v1000_v27, %v1001_v30 }
 0x1d0   : > { %v1003_v34 = vrot.slane %v1002_v48, 2 }
 0x1d2   : > { %v1004_v36 = vmax.f32 %v1002_v48, %v1003_v34 }
 0x1d4   : > { %v1005_v39 = vrot.slane %v1004_v36, 1 }
 0x1d6   : > { %v1006_v40 = vmax.f32 %v1004_v36, %v1005_v39 }
 0x1d8   : > { %v1018_v42 = vsel %vm1017_vm4, %v1006_v40, %v1016_v62 }
 0x1d9   : > { %v1021_v43 = vsel %vm1020_vm5, %v1018_v42, -inf  ;;  %v1027_v44 = vsel %vm1026_vm6, %v1018_v42, -inf }
 0x1da   : > { %1022 = vmax.xlane.f32.xlu0 %v1021_v43 }
 0x1e2   : > { %1028 = vmax.xlane.f32.xlu0 %v1027_v44 }
 0x24d   : > { %v1023_v45 = vpop.xlane.xlu0 %1022 }
 0x24e   : > { %v1025_v47 = vsel %vm1024_vm7, %v1023_v45, -inf }
 0x255   : > { %v1029_v49 = vpop.xlane.xlu0 %1028 }
 0x256   : > { %v1031_v50 = vsel %vm1030_vm8, %v1029_v49, %v1025_v47 }
 0x257   : > { %1033 = vst.msk [vmem:[%s234_s25] sm:$0xf] %vm1032_vm9, %v1031_v50 }
 0x258 PF: > { %p15_p4 = scmp.ge.s32.totalorder %s1367_s27, 6   ;;  %s1803_s15 = smov %s1284_s16 }
 0x259   : > { %s1804_s16 = smov %s1288_s17  ;;  %s1805_s17 = smov %s1377_s6 }
 0x25a   : > { %s1806_s18 = smov %s1367_s27  ;;  %17 = sbr.rel (!%p15_p4) target bundleno = 4 (0x4), region = 81 }
 0x25f   :  { %1053 = vsyncpa [#allocation4], 1 }
 0x260   :  { %1055 = vsyncpa [#allocation4 + $0x1], 1 }
 0x261   :  { %1056 = vsyncpa [#allocation6], 1 }
 0x262   :  { %1058 = vsyncpa [#allocation6 + $0x1], 1 }

</bundles_post_ra>
